<compile_context>
chip_gen: v6e
topology: v6e:2x2x1
jax: 0.10.0
libtpu: 0.0.40
codegen_flags: <defaults>
</compile_context>

<pallas_src>
import jax
import jax.numpy as jnp
from jax.experimental import pallas as pl
from jax.experimental.pallas import tpu as pltpu


def _round_up(x, m):
    return ((x + m - 1) // m) * m


def _discriminator_kernel(x_ref, w1_ref, b1_ref, w2_ref, b2_ref,
                          w3_ref, b3_ref, o_ref):
    # x_ref: (TN, Cin) bf16 tile of the batch; weights bf16; biases f32.
    x = x_ref[...]

    # lin1 + relu (MXU in bf16, f32 accumulate; epilogue in f32)
    h1 = jnp.dot(x, w1_ref[...], preferred_element_type=jnp.float32)
    h1 = jnp.maximum(h1 + b1_ref[...], 0.0)
    h1 = h1.astype(w2_ref.dtype)                      # back to bf16 for MXU

    # lin2 + relu
    h2 = jnp.dot(h1, w2_ref[...], preferred_element_type=jnp.float32)
    h2 = jnp.maximum(h2 + b2_ref[...], 0.0)
    h2 = h2.astype(w3_ref.dtype)

    # lin3 (no activation)
    out = jnp.dot(h2, w3_ref[...], preferred_element_type=jnp.float32)
    out = out + b3_ref[...]

    o_ref[...] = out.astype(o_ref.dtype)


def discriminator_forward(x, params, *, block_n=512):
    """x: (N, in_channels) float32. params: dict of torch-layout weights.

    block_n: batch-tile size; keep it a multiple of 256 on v6e/v7x for MXU
    row utilisation (128 is the floor on v5e). Weights/biases stay resident.
    """
    n, cin = x.shape
    hid = params["w1"].shape[0]
    cout = params["w3"].shape[0]

    # --- glue: layouts & dtypes -------------------------------------------
    # (out, in) -> (in, out) so the kernel does x @ W; matmul operands bf16.
    w1t = params["w1"].T.astype(jnp.bfloat16)
    w2t = params["w2"].T.astype(jnp.bfloat16)
    w3t = params["w3"].T.astype(jnp.bfloat16)
    b1 = params["b1"].reshape(1, -1).astype(jnp.float32)
    b2 = params["b2"].reshape(1, -1).astype(jnp.float32)
    b3 = params["b3"].reshape(1, -1).astype(jnp.float32)

    # --- batch tiling ------------------------------------------------------
    # Tile must be a multiple of 16 (bf16 sublane packing); pad N up to a
    # whole number of tiles, slice the padding back off at the end.
    tn = min(block_n, _round_up(n, 16))
    tn = _round_up(tn, 16)
    n_pad = _round_up(n, tn)
    x_bf16 = x.astype(jnp.bfloat16)
    if n_pad != n:
        x_bf16 = jnp.pad(x_bf16, ((0, n_pad - n), (0, 0)))
    grid = (n_pad // tn,)

    # x / out stream by batch tile; everything else is grid-invariant.
    x_spec = pl.BlockSpec((tn, cin), lambda i: (i, 0))
    out_spec = pl.BlockSpec((tn, cout), lambda i: (i, 0))
    resident = lambda arr: pl.BlockSpec(arr.shape, lambda i: (0,) * arr.ndim)

    out_padded = pl.pallas_call(
        _discriminator_kernel,
        out_shape=jax.ShapeDtypeStruct((n_pad, cout), jnp.float32),
        grid=grid,
        in_specs=[x_spec,
                  resident(w1t), resident(b1),
                  resident(w2t), resident(b2),
                  resident(w3t), resident(b3)],
        out_specs=out_spec,
        compiler_params=pltpu.CompilerParams(
            dimension_semantics=("parallel",),
            vmem_limit_bytes=32 * 1024 * 1024,
        ),
    )(x_bf16, w1t, b1, w2t, b2, w3t, b3)

    return out_padded[:n]


def init_params(key, in_channels, hidden_channels, out_channels):
    """Deterministic init mimicking torch.nn.Linear default U(-1/sqrt(fan_in), 1/sqrt(fan_in))."""
    ks = jax.random.split(key, 6)

    def linear(kw, kb, fan_in, fan_out):
        bound = 1.0 / jnp.sqrt(fan_in)
        w = jax.random.uniform(kw, (fan_out, fan_in), jnp.float32, -bound, bound)
        b = jax.random.uniform(kb, (fan_out,), jnp.float32, -bound, bound)
        return w, b

    w1, b1 = linear(ks[0], ks[1], in_channels, hidden_channels)
    w2, b2 = linear(ks[2], ks[3], hidden_channels, hidden_channels)
    w3, b3 = linear(ks[4], ks[5], hidden_channels, out_channels)
    return {"w1": w1, "b1": b1, "w2": w2, "b2": b2, "w3": w3, "b3": b3}


def reference_forward_f32(x, p):
    h = jnp.maximum(x @ p["w1"].T + p["b1"], 0.0)
    h = jnp.maximum(h @ p["w2"].T + p["b2"], 0.0)
    return h @ p["w3"].T + p["b3"]


def reference_forward_bf16(x, p):
    """Mirror the kernel's bf16-matmul / f32-accumulate numerics exactly."""
    bf = jnp.bfloat16

    def lin(h, w, b):
        return jnp.dot(h.astype(bf), w.T.astype(bf),
                       preferred_element_type=jnp.float32) + b

    h = jnp.maximum(lin(x, p["w1"], p["b1"]), 0.0)
    h = jnp.maximum(lin(h, p["w2"], p["b2"]), 0.0)
    return lin(h, p["w3"], p["b3"])


if __name__ == "__main__":
    key = jax.random.PRNGKey(0)
    k_x, k_p = jax.random.split(key)

    # Small shapes; N is deliberately not a multiple of the tile so the
    # padding path is exercised, and block_n=128 gives a 2-step grid.
    N, IN_C, HID_C, OUT_C = 200, 32, 64, 16
    x = jax.random.normal(k_x, (N, IN_C), jnp.float32)
    params = init_params(k_p, IN_C, HID_C, OUT_C)

    out = discriminator_forward(x, params, block_n=128)
    out = jax.block_until_ready(out)
    assert out.shape == (N, OUT_C), out.shape

    # Tight check against a reference with identical bf16/f32 numerics.
    ref_bf16 = reference_forward_bf16(x, params)
    assert jnp.allclose(out, ref_bf16, atol=1e-3, rtol=1e-3), \
        float(jnp.max(jnp.abs(out - ref_bf16)))

    # Loose sanity check against the pure-f32 PyTorch-equivalent math.
    ref_f32 = reference_forward_f32(x, params)
    assert jnp.allclose(out, ref_f32, atol=1e-1, rtol=1e-1), \
        float(jnp.max(jnp.abs(out - ref_f32)))

    print("KERNEL_OK")
</pallas_src>

<mosaic_0001>
module attributes {stable_mosaic.version = 11 : i64} {
  func.func @_discriminator_kernel(%arg0: i32, %arg1: memref<128x32xbf16, #tpu.memory_space<vmem>>, %arg2: memref<32x64xbf16, #tpu.memory_space<vmem>>, %arg3: memref<1x64xf32, #tpu.memory_space<vmem>>, %arg4: memref<64x64xbf16, #tpu.memory_space<vmem>>, %arg5: memref<1x64xf32, #tpu.memory_space<vmem>>, %arg6: memref<64x16xbf16, #tpu.memory_space<vmem>>, %arg7: memref<1x16xf32, #tpu.memory_space<vmem>>, %arg8: memref<128x16xf32, #tpu.memory_space<vmem>>) attributes {dimension_semantics = [#tpu.dimension_semantics<parallel>], iteration_bounds = array<i64: 2>, scalar_prefetch = 0 : i64, scratch_operands = 0 : i64, tpu.core_type = #tpu.core_type<tc>, window_params = [{transform_indices = @transform_0, window_bounds = array<i64: 128, 32>}, {pipeline_mode = #tpu.pipeline_mode<synchronous>, transform_indices = @transform_1, window_bounds = array<i64: 32, 64>}, {pipeline_mode = #tpu.pipeline_mode<synchronous>, transform_indices = @transform_2, window_bounds = array<i64: 1, 64>}, {pipeline_mode = #tpu.pipeline_mode<synchronous>, transform_indices = @transform_3, window_bounds = array<i64: 64, 64>}, {pipeline_mode = #tpu.pipeline_mode<synchronous>, transform_indices = @transform_4, window_bounds = array<i64: 1, 64>}, {pipeline_mode = #tpu.pipeline_mode<synchronous>, transform_indices = @transform_5, window_bounds = array<i64: 64, 16>}, {pipeline_mode = #tpu.pipeline_mode<synchronous>, transform_indices = @transform_6, window_bounds = array<i64: 1, 16>}, {transform_indices = @transform_7, window_bounds = array<i64: 128, 16>}]} {
    %c0 = arith.constant 0 : index
    %c0_0 = arith.constant 0 : index
    %0 = vector.load %arg1[%c0, %c0_0] : memref<128x32xbf16, #tpu.memory_space<vmem>>, vector<128x32xbf16>
    %c0_1 = arith.constant 0 : index
    %c0_2 = arith.constant 0 : index
    %1 = vector.load %arg2[%c0_1, %c0_2] : memref<32x64xbf16, #tpu.memory_space<vmem>>, vector<32x64xbf16>
    %cst = arith.constant dense<0.000000e+00> : vector<128x64xf32>
    %2 = tpu.matmul %0, %1, %cst {dimension_numbers = #tpu.dot_dimension_numbers<[1], [0], [0], [1], [0, 0, 1, 1], [], []>} : vector<128x32xbf16>, vector<32x64xbf16>, vector<128x64xf32> -> vector<128x64xf32>
    %c0_3 = arith.constant 0 : index
    %c0_4 = arith.constant 0 : index
    %3 = vector.load %arg3[%c0_3, %c0_4] : memref<1x64xf32, #tpu.memory_space<vmem>>, vector<1x64xf32>
    %4 = vector.broadcast %3 : vector<1x64xf32> to vector<128x64xf32>
    %5 = arith.addf %2, %4 : vector<128x64xf32>
    %cst_5 = arith.constant 0.000000e+00 : f32
    %6 = vector.broadcast %cst_5 : f32 to vector<128x64xf32>
    %7 = arith.maximumf %5, %6 : vector<128x64xf32>
    %8 = arith.truncf %7 : vector<128x64xf32> to vector<128x64xbf16>
    %c0_6 = arith.constant 0 : index
    %c0_7 = arith.constant 0 : index
    %9 = vector.load %arg4[%c0_6, %c0_7] : memref<64x64xbf16, #tpu.memory_space<vmem>>, vector<64x64xbf16>
    %cst_8 = arith.constant dense<0.000000e+00> : vector<128x64xf32>
    %10 = tpu.matmul %8, %9, %cst_8 {dimension_numbers = #tpu.dot_dimension_numbers<[1], [0], [0], [1], [0, 0, 1, 1], [], []>} : vector<128x64xbf16>, vector<64x64xbf16>, vector<128x64xf32> -> vector<128x64xf32>
    %c0_9 = arith.constant 0 : index
    %c0_10 = arith.constant 0 : index
    %11 = vector.load %arg5[%c0_9, %c0_10] : memref<1x64xf32, #tpu.memory_space<vmem>>, vector<1x64xf32>
    %12 = vector.broadcast %11 : vector<1x64xf32> to vector<128x64xf32>
    %13 = arith.addf %10, %12 : vector<128x64xf32>
    %cst_11 = arith.constant 0.000000e+00 : f32
    %14 = vector.broadcast %cst_11 : f32 to vector<128x64xf32>
    %15 = arith.maximumf %13, %14 : vector<128x64xf32>
    %16 = arith.truncf %15 : vector<128x64xf32> to vector<128x64xbf16>
    %c0_12 = arith.constant 0 : index
    %c0_13 = arith.constant 0 : index
    %17 = vector.load %arg6[%c0_12, %c0_13] : memref<64x16xbf16, #tpu.memory_space<vmem>>, vector<64x16xbf16>
    %cst_14 = arith.constant dense<0.000000e+00> : vector<128x16xf32>
    %18 = tpu.matmul %16, %17, %cst_14 {dimension_numbers = #tpu.dot_dimension_numbers<[1], [0], [0], [1], [0, 0, 1, 1], [], []>} : vector<128x64xbf16>, vector<64x16xbf16>, vector<128x16xf32> -> vector<128x16xf32>
    %c0_15 = arith.constant 0 : index
    %c0_16 = arith.constant 0 : index
    %19 = vector.load %arg7[%c0_15, %c0_16] : memref<1x16xf32, #tpu.memory_space<vmem>>, vector<1x16xf32>
    %20 = vector.broadcast %19 : vector<1x16xf32> to vector<128x16xf32>
    %21 = arith.addf %18, %20 : vector<128x16xf32>
    %c0_17 = arith.constant 0 : index
    %c0_18 = arith.constant 0 : index
    %22 = vector.load %arg8[%c0_17, %c0_18] : memref<128x16xf32, #tpu.memory_space<vmem>>, vector<128x16xf32>
    tpu.vector_store %arg8[%c0_17, %c0_18], %21 {strides = array<i32>} : memref<128x16xf32, #tpu.memory_space<vmem>>, vector<128x16xf32>,
    return
  }
  func.func @transform_0(%arg0: i32) -> (i32, i32) {
    %c0_i32 = arith.constant 0 : i32
    %c0_i32_0 = arith.constant 0 : i32
    return %arg0, %c0_i32 : i32, i32
  }
  func.func @transform_1(%arg0: i32) -> (i32, i32) {
    %c0_i32 = arith.constant 0 : i32
    %c0_i32_0 = arith.constant 0 : i32
    %c0_i32_1 = arith.constant 0 : i32
    return %c0_i32, %c0_i32_0 : i32, i32
  }
  func.func @transform_2(%arg0: i32) -> (i32, i32) {
    %c0_i32 = arith.constant 0 : i32
    %c0_i32_0 = arith.constant 0 : i32
    %c0_i32_1 = arith.constant 0 : i32
    return %c0_i32, %c0_i32_0 : i32, i32
  }
  func.func @transform_3(%arg0: i32) -> (i32, i32) {
    %c0_i32 = arith.constant 0 : i32
    %c0_i32_0 = arith.constant 0 : i32
    %c0_i32_1 = arith.constant 0 : i32
    return %c0_i32, %c0_i32_0 : i32, i32
  }
  func.func @transform_4(%arg0: i32) -> (i32, i32) {
    %c0_i32 = arith.constant 0 : i32
    %c0_i32_0 = arith.constant 0 : i32
    %c0_i32_1 = arith.constant 0 : i32
    return %c0_i32, %c0_i32_0 : i32, i32
  }
  func.func @transform_5(%arg0: i32) -> (i32, i32) {
    %c0_i32 = arith.constant 0 : i32
    %c0_i32_0 = arith.constant 0 : i32
    %c0_i32_1 = arith.constant 0 : i32
    return %c0_i32, %c0_i32_0 : i32, i32
  }
  func.func @transform_6(%arg0: i32) -> (i32, i32) {
    %c0_i32 = arith.constant 0 : i32
    %c0_i32_0 = arith.constant 0 : i32
    %c0_i32_1 = arith.constant 0 : i32
    return %c0_i32, %c0_i32_0 : i32, i32
  }
  func.func @transform_7(%arg0: i32) -> (i32, i32) {
    %c0_i32 = arith.constant 0 : i32
    %c0_i32_0 = arith.constant 0 : i32
    return %arg0, %c0_i32 : i32, i32
  }
}

</mosaic_0001>

<bundles_post_ra>
// kernel: tpu_custom_call.1
= control target key start
LH: loop header
LB: loop body
LE: loop exit
PB: predicated region body
PF: predicated region fallthrough
CT: control target
= control target key end

     0   :  { %s1162_s24 = smov 0   ;;  %s1280_s0 = inlined_call_operand.vmem [shape: bf16[256,32], index: 0, kind: input, shape index: {}]   ;;  %s1281_s1 = inlined_call_operand.vmem [shape: bf16[32,64], index: 1, kind: input, shape index: {}]   ;;  %s1282_s2 = inlined_call_operand.vmem [shape: f32[1,64], index: 2, kind: input, shape index: {}]   ;;  %s1283_s3 = inlined_call_operand.vmem [shape: bf16[64,64], index: 3, kind: input, shape index: {}]   ;;  %s1284_s4 = inlined_call_operand.vmem [shape: f32[1,64], index: 4, kind: input, shape index: {}]   ;;  %s1285_s5 = inlined_call_operand.vmem [shape: bf16[64,16], index: 5, kind: input, shape index: {}]   ;;  %s1286_s6 = inlined_call_operand.vmem [shape: f32[1,16], index: 6, kind: input, shape index: {}]   ;;  %s1287_s7 = inlined_call_operand.vmem [shape: f32[256,16], index: 7, kind: output, shape index: {}]  }
   0x1 LB: > { %s926_s25 = sadd.s32 4294967295, %s1120_s24   ;;  %p930_p0 = scmp.ge.s32.totalorder %s1120_s24, 1  ;;  %s1120_s24 = sphi %s1162_s24, %s17_s24  }
   0x2   : > { %p238_p1 = scmp.lt.s32.totalorder %s1120_s24, 3 }
   0x4   : > { %p239_p2 = pnand %p930_p0, %p238_p1 }
   0x5   : > { %s931_s28 = sshll.u32 (!%p239_p2), %s926_s25, 4 }
   0x6   : > { %242 = sbr.rel (%p239_p2) target bundleno = 658 (0x292), region = 48  ;;  %p271_p3 = scmp.lt.s32.totalorder (!%p239_p2), %s931_s28, 31 }
   0xb   : > { %v1096_v0 = vld [vmem:[%s1281_s1 + $0x8] sm:$0xff]   ;;  %v1097_v1 = vld [vmem:[%s1281_s1] sm:$0xff]   ;;  %s1289_s28 = smov (!%p271_p3, %s931_s28), 31  ;;  %v1106_v2 = vld [vmem:[%s1283_s3 + $0x18] sm:$0xff]   ;;  %vm362_vm0 = vcmask 261120   ;;  %vm547_vm1 = vcmask 523264  }
   0xc   : > { %1016 = vmatprep.subr.bf16.mxu0 %v1096_v0  ;;  %1084 = vmatprep.subr.bf16.mxu1 %v1096_v0  ;;  %s932_s10 = sshll.u32 %s1289_s28, 2  ;;  %v1107_v11 = vld [vmem:[%s1283_s3 + $0x10] sm:$0xff]   ;;  %v1108_v12 = vld [vmem:[%s1283_s3 + $0x8] sm:$0xff]   ;;  %v1109_v13 = vld [vmem:[%s1283_s3] sm:$0xff]   ;;  %s934_s11 = sshll.u32 %s1289_s28, 3  ;;  %vm853_vm2 = vcmask 130048  }
   0xd   : > { %1017 = vmatpush3.bf16.msra.mxu0 %v1096_v0  ;;  %1086 = vmatpush3.bf16.msra.mxu1 %v1096_v0  ;;  %s274_s13 = scalar_lea.vmem %s1280_s0, %s932_s10  ;;  %v1110_v14 = vld [vmem:[%s1285_s5 + $0x18] sm:$0xff]   ;;  %v935_v17 = vld [vmem:[%s1282_s2] ss:$0 sm:$0xff]  ;;  %s1243_s16 = scalar_lea.vmem %s1287_s7, %s934_s11 }
   0xe   : > { %1018 = vmatprep.subr.bf16.mxu0 %v1097_v1  ;;  %1085 = vmatprep.subr.bf16.mxu1 %v1097_v1  ;;  %v1098_v3 = vld [vmem:[%s274_s13] sm:$0xff]   ;;  %v1099_v4 = vld [vmem:[%s274_s13 + $0x8] sm:$0xff]   ;;  %v1100_v5 = vld [vmem:[%s274_s13 + $0x10] sm:$0xff]  }
   0xf   : > { %1020 = vmatprep.mubr.msk.bf16.mxu0 %vm362_vm0, %v1098_v3  ;;  %v1102_v6 = vld [vmem:[%s274_s13 + $0x20] sm:$0xff]   ;;  %v1103_v7 = vld [vmem:[%s274_s13 + $0x28] sm:$0xff]   ;;  %v1104_v8 = vld [vmem:[%s274_s13 + $0x30] sm:$0xff]  }
  0x10   : > { %1028 = vmatprep.mubr.msk.bf16.mxu1 %vm362_vm0, %v1102_v6  ;;  %v1101_v9 = vld [vmem:[%s274_s13 + $0x18] sm:$0xff]  }
  0x11   : > { %1019 = vmatpush3.bf16.msra.mxu0 %v1097_v1  ;;  %1087 = vmatpush3.bf16.msra.mxu1 %v1097_v1  ;;  %v1105_v10 = vld [vmem:[%s274_s13 + $0x38] sm:$0xff]  }
  0x12   : > { %1036 = vmatprep.subr.bf16.mxu1 %v1106_v2  ;;  %1060 = vmatprep.subr.bf16.mxu0 %v1110_v14 }
  0x14   : > { %1021 = vmatmul.mubr.msk.bf16.vlgmr.msra.gmra.mxu0 %vm362_vm0, %v1099_v4  ;;  %1029 = vmatmul.mubr.msk.bf16.vlgmr.msra.gmra.mxu1 %vm362_vm0, %v1103_v7 }
  0x15   : > { %1024 = vmatprep.mubr.msk.bf16.mxu0 %vm362_vm0, %v1100_v5  ;;  %1032 = vmatprep.mubr.msk.bf16.mxu1 %vm362_vm0, %v1104_v8  ;;  %v1111_v8 = vld [vmem:[%s1285_s5 + $0x10] sm:$0xff]  }
  0x16   : > { %1037 = vmatpush3.bf16.msra.mxu1 %v1106_v2  ;;  %1061 = vmatpush3.bf16.msra.mxu0 %v1110_v14 }
  0x17   : > { %1038 = vmatprep.subr.bf16.mxu1 %v1107_v11  ;;  %1062 = vmatprep.subr.bf16.mxu0 %v1111_v8 }
  0x1a   : > { %1039 = vmatpush3.bf16.msra.mxu1 %v1107_v11  ;;  %1063 = vmatpush3.bf16.msra.mxu0 %v1111_v8 }
  0x1b   : > { %1040 = vmatprep.subr.bf16.mxu1 %v1108_v12 }
  0x1c   : > { %1025 = vmatmul.mubr.msk.bf16.gmra.mxu0 %vm362_vm0, %v1101_v9  ;;  %1033 = vmatmul.mubr.msk.bf16.gmra.mxu1 %vm362_vm0, %v1105_v10  ;;  %v1112_v9 = vld [vmem:[%s1285_s5 + $0x8] sm:$0xff]   ;;  %v1113_v10 = vld [vmem:[%s1285_s5] sm:$0xff]  }
  0x1d   : > { %1064 = vmatprep.subr.bf16.mxu0 %v1112_v9 }
  0x1e   : > { %1041 = vmatpush3.bf16.msra.mxu1 %v1108_v12  ;;  %1065 = vmatpush3.bf16.msra.mxu0 %v1112_v9 }
  0x1f   : > { %1042 = vmatprep.subr.bf16.mxu1 %v1109_v13  ;;  %1066 = vmatprep.subr.bf16.mxu0 %v1113_v10 }
  0x22   : > { %1043 = vmatpush3.bf16.msra.mxu1 %v1109_v13  ;;  %1067 = vmatpush3.bf16.msra.mxu0 %v1113_v10  ;;  %v954_v13 = vld [vmem:[%s1284_s4] ss:$0 sm:$0xff] }
  0xd4   : > { %v1022_v15 = vpop.f32.mrf.mxu0  ;;  %v1030_v19 = vpop.f32.mrf.mxu1 }
  0xd5   : > { %v430_v22 = vadd.f32 %v1022_v15, %v935_v17  ;;  %v462_v58 = vadd.f32 %v1030_v19, %v935_v17 }
  0xd6   : > { %v421_v16 = vpop.f32.mrf.mxu0  ;;  %v453_v24 = vpop.f32.mrf.mxu1 }
  0xd7   : > { %v422_v20 = vadd.f32 %v935_v17, %v421_v16  ;;  %v486_v31 = vmax.f32 %v430_v22, 0.0  ;;  %v454_v35 = vadd.f32 %v935_v17, %v453_v24  ;;  %v494_v63 = vmax.f32 %v462_v58, 0.0 }
  0xd8   : > { %v1023_v18 = vpop.f32.mrf.mxu0  ;;  %v1031_v28 = vpop.f32.mrf.mxu1 }
  0xd9   : > { %v433_v21 = vadd.f32 %v1023_v18, %v935_v17  ;;  %v484_v29 = vmax.f32 %v422_v20, 0.0  ;;  %v492_v45 = vmax.f32 %v454_v35, 0.0  ;;  %v465_v60 = vadd.f32 %v1031_v28, %v935_v17 }
  0xda   : > { %v424_v23 = vpop.f32.mrf.mxu0  ;;  %v456_v33 = vpop.f32.mrf.mxu1 }
  0xdb   : > { %v425_v25 = vadd.f32 %v935_v17, %v424_v23  ;;  %v487_v26 = vmax.f32 %v433_v21, 0.0  ;;  %v457_v36 = vadd.f32 %v935_v17, %v456_v33  ;;  %v495_v0 = vmax.f32 %v465_v60, 0.0 }
  0xdc   : > { %v1026_v27 = vpop.f32.mrf.mxu0  ;;  %v1034_v39 = vpop.f32.mrf.mxu1 }
  0xdd   : > { %v485_v30 = vmax.f32 %v425_v25, 0.0  ;;  %v501_v37 = vpack.c.bf16 %v487_v26, %v486_v31  ;;  %v446_v42 = vadd.f32 %v1026_v27, %v935_v17  ;;  %v493_v47 = vmax.f32 %v457_v36, 0.0 }
  0xde   : > { %v437_v32 = vpop.f32.mrf.mxu0  ;;  %v469_v44 = vpop.f32.mrf.mxu1  ;;  %v505_v2 = vpack.c.bf16 %v495_v0, %v494_v63  ;;  %v478_v3 = vadd.f32 %v1034_v39, %v935_v17 }
  0xdf   : > { %v500_v34 = vpack.c.bf16 %v485_v30, %v484_v29  ;;  %v438_v40 = vadd.f32 %v935_v17, %v437_v32  ;;  %v490_v52 = vmax.f32 %v446_v42, 0.0  ;;  %v504_v55 = vpack.c.bf16 %v493_v47, %v492_v45 }
  0xe0   : > { %v1027_v38 = vpop.f32.mrf.mxu0  ;;  %v1035_v49 = vpop.f32.mrf.mxu1  ;;  %v470_v56 = vadd.f32 %v935_v17, %v469_v44  ;;  %v498_v5 = vmax.f32 %v478_v3, 0.0 }
  0xe1   : > { %v449_v41 = vadd.f32 %v1027_v38, %v935_v17  ;;  %1044 = vmatprep.mubr.msk.bf16.mxu1 %vm547_vm1, %v500_v34  ;;  %v488_v50 = vmax.f32 %v438_v40, 0.0  ;;  %v481_v4 = vadd.f32 %v1035_v49, %v935_v17 }
  0xe2   : > { %v440_v43 = vpop.f32.mrf.mxu0  ;;  %1045 = vmatmul.mubr.msk.bf16.vlgmr.msra.gmra.mxu1 %vm547_vm1, %v501_v37  ;;  %v472_v53 = vpop.f32.mrf.mxu1  ;;  %v496_v61 = vmax.f32 %v470_v56, 0.0 }
  0xe3   : > { %v441_v46 = vadd.f32 %v935_v17, %v440_v43  ;;  %v491_v48 = vmax.f32 %v449_v41, 0.0  ;;  %v473_v57 = vadd.f32 %v935_v17, %v472_v53  ;;  %v499_v6 = vmax.f32 %v481_v4, 0.0  ;;  %v967_v4 = vld [vmem:[%s1286_s6] ss:$0 sm:$0xff] }
  0xe5   : > { %v489_v51 = vmax.f32 %v441_v46, 0.0  ;;  %v503_v59 = vpack.c.bf16 %v491_v48, %v490_v52  ;;  %v497_v62 = vmax.f32 %v473_v57, 0.0  ;;  %v507_v7 = vpack.c.bf16 %v499_v6, %v498_v5 }
  0xe7   : > { %v502_v54 = vpack.c.bf16 %v489_v51, %v488_v50  ;;  %v506_v1 = vpack.c.bf16 %v497_v62, %v496_v61 }
  0xe9   : > { %1048 = vmatprep.mubr.msk.bf16.mxu1 %vm547_vm1, %v502_v54 }
  0xea   : > { %1049 = vmatmul.mubr.msk.bf16.gmra.mxu1 %vm547_vm1, %v503_v59 }
  0xeb   : > { %1052 = vmatprep.mubr.msk.bf16.mxu1 %vm547_vm1, %v504_v55 }
  0xf2   : > { %1053 = vmatmul.mubr.msk.bf16.gmra.mxu1 %vm547_vm1, %v505_v2 }
  0xf3   : > { %1056 = vmatprep.mubr.msk.bf16.mxu1 %vm547_vm1, %v506_v1 }
  0xfa   : > { %1057 = vmatmul.mubr.msk.bf16.gmra.mxu1 %vm547_vm1, %v507_v7 }
 0x1a2   : > { %v1046_v11 = vpop.f32.mrf.mxu1 }
 0x1a3   : > { %v615_v17 = vadd.f32 %v1046_v11, %v954_v13 }
 0x1a4   : > { %v606_v12 = vpop.f32.mrf.mxu1 }
 0x1a5   : > { %v607_v15 = vadd.f32 %v954_v13, %v606_v12  ;;  %v671_v24 = vmax.f32 %v615_v17, 0.0 }
 0x1a6   : > { %v1047_v14 = vpop.f32.mrf.mxu1 }
 0x1a7   : > { %v618_v16 = vadd.f32 %v1047_v14, %v954_v13  ;;  %v669_v22 = vmax.f32 %v607_v15, 0.0 }
 0x1a8   : > { %v609_v18 = vpop.f32.mrf.mxu1 }
 0x1a9   : > { %v610_v19 = vadd.f32 %v954_v13, %v609_v18  ;;  %v672_v20 = vmax.f32 %v618_v16, 0.0 }
 0x1aa   : > { %v1050_v21 = vpop.f32.mrf.mxu1 }
 0x1ab   : > { %v670_v23 = vmax.f32 %v610_v19, 0.0  ;;  %v686_v27 = vpack.c.bf16 %v672_v20, %v671_v24  ;;  %v631_v31 = vadd.f32 %v1050_v21, %v954_v13 }
 0x1ac   : > { %v622_v25 = vpop.f32.mrf.mxu1 }
 0x1ad   : > { %v685_v26 = vpack.c.bf16 %v670_v23, %v669_v22  ;;  %v623_v29 = vadd.f32 %v954_v13, %v622_v25  ;;  %v675_v38 = vmax.f32 %v631_v31, 0.0 }
 0x1ae   : > { %v1051_v28 = vpop.f32.mrf.mxu1 }
 0x1af   : > { %v634_v30 = vadd.f32 %v1051_v28, %v954_v13  ;;  %1068 = vmatprep.mubr.msk.bf16.mxu0 %vm547_vm1, %v685_v26  ;;  %v673_v36 = vmax.f32 %v623_v29, 0.0 }
 0x1b0   : > { %v625_v32 = vpop.f32.mrf.mxu1  ;;  %1069 = vmatmul.mubr.msk.bf16.vlgmr.msra.gmra.mxu0 %vm547_vm1, %v686_v27 }
 0x1b1   : > { %v626_v33 = vadd.f32 %v954_v13, %v625_v32  ;;  %v676_v34 = vmax.f32 %v634_v30, 0.0 }
 0x1b2   : > { %v1054_v35 = vpop.f32.mrf.mxu1 }
 0x1b3   : > { %v674_v37 = vmax.f32 %v626_v33, 0.0  ;;  %v688_v41 = vpack.c.bf16 %v676_v34, %v675_v38  ;;  %v647_v45 = vadd.f32 %v1054_v35, %v954_v13 }
 0x1b4   : > { %v638_v39 = vpop.f32.mrf.mxu1 }
 0x1b5   : > { %v687_v40 = vpack.c.bf16 %v674_v37, %v673_v36  ;;  %v639_v43 = vadd.f32 %v954_v13, %v638_v39  ;;  %v679_v52 = vmax.f32 %v647_v45, 0.0 }
 0x1b6   : > { %v1055_v42 = vpop.f32.mrf.mxu1 }
 0x1b7   : > { %v650_v44 = vadd.f32 %v1055_v42, %v954_v13  ;;  %1072 = vmatprep.mubr.msk.bf16.mxu0 %vm547_vm1, %v687_v40  ;;  %v677_v50 = vmax.f32 %v639_v43, 0.0 }
 0x1b8   : > { %v641_v46 = vpop.f32.mrf.mxu1  ;;  %1073 = vmatmul.mubr.msk.bf16.gmra.mxu0 %vm547_vm1, %v688_v41 }
 0x1b9   : > { %v642_v47 = vadd.f32 %v954_v13, %v641_v46  ;;  %v680_v48 = vmax.f32 %v650_v44, 0.0 }
 0x1ba   : > { %v1058_v49 = vpop.f32.mrf.mxu1 }
 0x1bb   : > { %v678_v51 = vmax.f32 %v642_v47, 0.0  ;;  %v690_v55 = vpack.c.bf16 %v680_v48, %v679_v52  ;;  %v663_v59 = vadd.f32 %v1058_v49, %v954_v13 }
 0x1bc   : > { %v654_v53 = vpop.f32.mrf.mxu1 }
 0x1bd   : > { %v689_v54 = vpack.c.bf16 %v678_v51, %v677_v50  ;;  %v655_v57 = vadd.f32 %v954_v13, %v654_v53  ;;  %v683_v1 = vmax.f32 %v663_v59, 0.0 }
 0x1be   : > { %v1059_v56 = vpop.f32.mrf.mxu1 }
 0x1bf   : > { %v666_v58 = vadd.f32 %v1059_v56, %v954_v13  ;;  %1076 = vmatprep.mubr.msk.bf16.mxu0 %vm547_vm1, %v689_v54  ;;  %v681_v63 = vmax.f32 %v655_v57, 0.0 }
 0x1c0   : > { %v657_v60 = vpop.f32.mrf.mxu1  ;;  %1077 = vmatmul.mubr.msk.bf16.gmra.mxu0 %vm547_vm1, %v690_v55 }
 0x1c1   : > { %v658_v61 = vadd.f32 %v954_v13, %v657_v60  ;;  %v684_v62 = vmax.f32 %v666_v58, 0.0 }
 0x1c3   : > { %v682_v0 = vmax.f32 %v658_v61, 0.0  ;;  %v692_v3 = vpack.c.bf16 %v684_v62, %v683_v1 }
 0x1c5   : > { %v691_v2 = vpack.c.bf16 %v682_v0, %v681_v63 }
 0x1c7   : > { %1080 = vmatprep.mubr.msk.bf16.mxu0 %vm547_vm1, %v691_v2 }
 0x1c8   : > { %1081 = vmatmul.mubr.msk.bf16.gmra.mxu0 %vm547_vm1, %v692_v3 }
 0x270   : > { %v1070_v5 = vpop.f32.mrf.mxu0 }
 0x271   : > { %v799_v6 = vadd.f32 %v1070_v5, %v967_v4 }
 0x272   : > { %v790_v7 = vpop.f32.mrf.mxu0 }
 0x273   : > { %856 = vst.msk [vmem:[%s1243_s16 + $0x10] sm:$0xff] %vm853_vm2, %v799_v6  ;;  %v791_v8 = vadd.f32 %v967_v4, %v790_v7 }
 0x274   : > { %v1071_v9 = vpop.f32.mrf.mxu0 }
 0x275   : > { %854 = vst.msk [vmem:[%s1243_s16] sm:$0xff] %vm853_vm2, %v791_v8  ;;  %v802_v10 = vadd.f32 %v1071_v9, %v967_v4 }
 0x276   : > { %v793_v11 = vpop.f32.mrf.mxu0 }
 0x277   : > { %857 = vst.msk [vmem:[%s1243_s16 + $0x18] sm:$0xff] %vm853_vm2, %v802_v10  ;;  %v794_v12 = vadd.f32 %v967_v4, %v793_v11 }
 0x278   : > { %v1074_v13 = vpop.f32.mrf.mxu0 }
 0x279   : > { %855 = vst.msk [vmem:[%s1243_s16 + $0x8] sm:$0xff] %vm853_vm2, %v794_v12  ;;  %v815_v14 = vadd.f32 %v1074_v13, %v967_v4 }
 0x27a   : > { %v806_v15 = vpop.f32.mrf.mxu0 }
 0x27b   : > { %860 = vst.msk [vmem:[%s1243_s16 + $0x30] sm:$0xff] %vm853_vm2, %v815_v14  ;;  %v807_v16 = vadd.f32 %v967_v4, %v806_v15 }
 0x27c   : > { %v1075_v17 = vpop.f32.mrf.mxu0 }
 0x27d   : > { %858 = vst.msk [vmem:[%s1243_s16 + $0x20] sm:$0xff] %vm853_vm2, %v807_v16  ;;  %v818_v18 = vadd.f32 %v1075_v17, %v967_v4 }
 0x27e   : > { %v809_v19 = vpop.f32.mrf.mxu0 }
 0x27f   : > { %861 = vst.msk [vmem:[%s1243_s16 + $0x38] sm:$0xff] %vm853_vm2, %v818_v18  ;;  %v810_v20 = vadd.f32 %v967_v4, %v809_v19 }
 0x280   : > { %v1078_v21 = vpop.f32.mrf.mxu0 }
 0x281   : > { %859 = vst.msk [vmem:[%s1243_s16 + $0x28] sm:$0xff] %vm853_vm2, %v810_v20  ;;  %v831_v22 = vadd.f32 %v1078_v21, %v967_v4 }
 0x282   : > { %v822_v23 = vpop.f32.mrf.mxu0 }
 0x283   : > { %864 = vst.msk [vmem:[%s1243_s16 + $0x50] sm:$0xff] %vm853_vm2, %v831_v22  ;;  %v823_v24 = vadd.f32 %v967_v4, %v822_v23 }
 0x284   : > { %v1079_v25 = vpop.f32.mrf.mxu0 }
 0x285   : > { %862 = vst.msk [vmem:[%s1243_s16 + $0x40] sm:$0xff] %vm853_vm2, %v823_v24  ;;  %v834_v26 = vadd.f32 %v1079_v25, %v967_v4 }
 0x286   : > { %v825_v27 = vpop.f32.mrf.mxu0 }
 0x287   : > { %865 = vst.msk [vmem:[%s1243_s16 + $0x58] sm:$0xff] %vm853_vm2, %v834_v26  ;;  %v826_v28 = vadd.f32 %v967_v4, %v825_v27 }
 0x288   : > { %v1082_v29 = vpop.f32.mrf.mxu0 }
 0x289   : > { %863 = vst.msk [vmem:[%s1243_s16 + $0x48] sm:$0xff] %vm853_vm2, %v826_v28  ;;  %v847_v30 = vadd.f32 %v1082_v29, %v967_v4 }
 0x28a   : > { %v838_v31 = vpop.f32.mrf.mxu0 }
 0x28b   : > { %868 = vst.msk [vmem:[%s1243_s16 + $0x70] sm:$0xff] %vm853_vm2, %v847_v30  ;;  %v839_v32 = vadd.f32 %v967_v4, %v838_v31 }
 0x28c   : > { %v1083_v33 = vpop.f32.mrf.mxu0 }
 0x28d   : > { %866 = vst.msk [vmem:[%s1243_s16 + $0x60] sm:$0xff] %vm853_vm2, %v839_v32  ;;  %v850_v34 = vadd.f32 %v1083_v33, %v967_v4 }
 0x28e   : > { %v841_v35 = vpop.f32.mrf.mxu0 }
 0x28f   : > { %869 = vst.msk [vmem:[%s1243_s16 + $0x78] sm:$0xff] %vm853_vm2, %v850_v34  ;;  %v842_v36 = vadd.f32 %v967_v4, %v841_v35 }
 0x291   : > { %867 = vst.msk [vmem:[%s1243_s16 + $0x68] sm:$0xff] %vm853_vm2, %v842_v36 }
 0x292 PF: > { %s17_s24 = sadd.s32 1, %s1120_s24  }
 0x293   : > { %p14_p4 = scmp.ge.s32.totalorder %s17_s24, 4  }
 0x295   :  { %16 = sbr.rel (!%p14_p4) target bundleno = 1 (0x1), region = 78 }

</bundles_post_ra>
